<compile_context>
chip_gen: v7x
topology: tpu7x:2x2x1
jax: 0.10.0
libtpu: 0.0.40
codegen_flags: <defaults>
</compile_context>

<pallas_src>
import functools
import math

import jax
import jax.numpy as jnp
from jax.experimental import pallas as pl
from jax.experimental.pallas import tpu as pltpu


def _round_up(x, m):
    return -(-x // m) * m


# ----------------------------------------------------------------------------
# Fused Pallas kernel: whole autoencoder (all Linear+ReLU layers), one batch
# tile per grid step.
# ----------------------------------------------------------------------------
def _fused_ae_kernel(x_ref, w_ref, b_ref, o_ref, *, layer_specs):
    """x_ref: (TB, P) f32 batch tile, w_ref: (L, P, P) f32|bf16 (resident),
    b_ref: (L, 1, P) f32 (resident), o_ref: (TB, P) f32.

    layer_specs is a static tuple of (din, dout, apply_relu); the Python loop
    is unrolled at trace time, so each layer is one MXU matmul on
    VMEM-resident tiles followed by f32 bias + ReLU on the VPU.
    """
    mxu_bf16 = jnp.dtype(w_ref.dtype) == jnp.dtype(jnp.bfloat16)
    h = x_ref[...]                                    # (TB, P) f32
    for i, (_din, _dout, apply_relu) in enumerate(layer_specs):
        w = w_ref[i]                                  # (P, P), static index
        lhs = h.astype(jnp.bfloat16) if mxu_bf16 else h
        y = jnp.dot(lhs, w, preferred_element_type=jnp.float32)
        h = y + b_ref[i]                              # bias + activation in f32
        if apply_relu:
            h = jnp.maximum(h, 0.0)
    o_ref[...] = h.astype(o_ref.dtype)


# Max batch tile: multiple of 256 (fills v6e/v7x MXU rows, 128 on v5e is a
# divisor).  Sized against v7x's 64 MiB per-core VMEM with huge headroom.
_TB_MAX = 512


@functools.partial(jax.jit, static_argnames=("layer_specs",))
def autoencoder_forward(x, w_stack, b_stack, *, layer_specs):
    """Full autoencoder forward: decoder(encoder(x)) in one fused kernel.

    x        : (batch, input_dim) f32
    w_stack  : (L, P, P) f32 or bf16  zero-padded weights (x @ W layout)
    b_stack  : (L, 1, P) f32          zero-padded biases
    returns  : (batch, input_dim) f32 reconstruction
    """
    batch, in_dim = x.shape
    n_layers, _, pad_dim = w_stack.shape

    # Batch tiling: largest sublane(8)-aligned tile up to _TB_MAX.
    bpad8 = _round_up(batch, 8)
    tb = bpad8 if bpad8 <= _TB_MAX else _TB_MAX
    bpad = _round_up(batch, tb)
    grid = (bpad // tb,)

    # Lane/sublane-dense, zero-padded input slab (pad lanes stay 0 throughout).
    # TODO(synk): could fold this pad into the pallas_call via allow_input_fusion
    # to shave one HBM round trip at tiny batch.
    x_p = jnp.zeros((bpad, pad_dim), jnp.float32).at[:batch, :in_dim].set(x)

    flops = 2 * n_layers * bpad * pad_dim * pad_dim
    bytes_accessed = (
        bpad * pad_dim * 4 * 2                               # x in + out
        + w_stack.size * jnp.dtype(w_stack.dtype).itemsize   # resident weights
        + b_stack.size * 4                                   # biases
    )

    out_p = pl.pallas_call(
        functools.partial(_fused_ae_kernel, layer_specs=layer_specs),
        out_shape=jax.ShapeDtypeStruct((bpad, pad_dim), jnp.float32),
        grid=grid,
        in_specs=[
            # batch tile, streamed/double-buffered over the grid
            pl.BlockSpec((tb, pad_dim), lambda i: (i, 0)),
            # weights/biases: constant index_map -> DMA'd once, VMEM-resident
            pl.BlockSpec((n_layers, pad_dim, pad_dim), lambda i: (0, 0, 0)),
            pl.BlockSpec((n_layers, 1, pad_dim), lambda i: (0, 0, 0)),
        ],
        out_specs=pl.BlockSpec((tb, pad_dim), lambda i: (i, 0)),
        compiler_params=pltpu.CompilerParams(
            # batch tiles are independent -> shard across v7x's 2 TCs
            dimension_semantics=("parallel",),
            vmem_limit_bytes=32 * 1024 * 1024,
        ),
        cost_estimate=pl.CostEstimate(
            flops=flops, transcendentals=0, bytes_accessed=bytes_accessed),
    )(x_p, w_stack, b_stack)

    out_dim = layer_specs[-1][1]                      # == input_dim
    return out_p[:batch, :out_dim]


# ----------------------------------------------------------------------------
# Network spec / parameter construction (mirrors the PyTorch __init__ exactly)
# ----------------------------------------------------------------------------
def build_layer_dims(input_dim, factor, output_dim):
    assert 0 < factor < 1, "Factor value out of range"
    assert input_dim > output_dim, "Encoding dim cannot be greater than original dim"
    layers = []
    d = input_dim
    while int(factor * d) > output_dim:
        layers.append((d, int(factor * d)))
        d = int(d * factor)
    layers.append((d, output_dim))
    return layers


def build_network_spec(input_dim, factor, output_dim, non_linearity=None):
    """Flat (din, dout, apply_relu) list: encoder layers then decoder layers."""
    if non_linearity not in (None, "ReLU"):
        # TODO(synk): only ReLU (and identity) are fused in-kernel; other torch
        # activations would need their own elementwise branch in the kernel
        # (and act(0)=0 padding analysis), so refuse rather than silently
        # substitute ReLU.
        raise NotImplementedError(f"Unsupported non_linearity: {non_linearity}")
    layer_dims = build_layer_dims(input_dim, factor, output_dim)
    n = len(layer_dims)
    use_act = non_linearity is not None
    spec = []
    for i, (din, dout) in enumerate(layer_dims):                 # encoder
        spec.append((din, dout, use_act and i < n - 1))
    for i, (din, dout) in enumerate(reversed(layer_dims)):       # decoder
        spec.append((dout, din, use_act and i < n - 1))
    return tuple(spec)


def init_linear_params(key, fan_in, fan_out):
    """torch.nn.Linear default init: U(-1/sqrt(fan_in), 1/sqrt(fan_in))."""
    kw, kb = jax.random.split(key)
    bound = 1.0 / math.sqrt(fan_in)
    # Stored as (fan_in, fan_out) so the kernel computes x @ W.
    w = jax.random.uniform(kw, (fan_in, fan_out), jnp.float32, -bound, bound)
    b = jax.random.uniform(kb, (fan_out,), jnp.float32, -bound, bound)
    return w, b


def build_raw_params(key, layer_specs):
    keys = jax.random.split(key, len(layer_specs))
    return [init_linear_params(k, din, dout)
            for k, (din, dout, _) in zip(keys, layer_specs)]


def stack_padded_params(raw_params, layer_specs, pad_dim, weight_dtype=jnp.bfloat16):
    """Zero-padded, stacked (L,P,P) weights (cast once at build time) and
    (L,1,P) f32 biases."""
    w_pad, b_pad = [], []
    for (w, b), (din, dout, _) in zip(raw_params, layer_specs):
        wp = jnp.zeros((pad_dim, pad_dim), jnp.float32).at[:din, :dout].set(w)
        w_pad.append(wp.astype(weight_dtype))
        b_pad.append(jnp.zeros((1, pad_dim), jnp.float32).at[0, :dout].set(b))
    return jnp.stack(w_pad), jnp.stack(b_pad)


def reference_forward(x, raw_params, layer_specs, mxu_bf16=False):
    """Pure-jnp reference (unpadded) for correctness checking."""
    h = x
    for (w, b), (_din, _dout, apply_relu) in zip(raw_params, layer_specs):
        if mxu_bf16:
            h = jnp.dot(h.astype(jnp.bfloat16), w.astype(jnp.bfloat16),
                        preferred_element_type=jnp.float32) + b
        else:
            h = jnp.dot(h, w, preferred_element_type=jnp.float32) + b
        if apply_relu:
            h = jnp.maximum(h, 0.0)
    return h


# ----------------------------------------------------------------------------
# Main
# ----------------------------------------------------------------------------
if __name__ == "__main__":
    input_dim = 64
    factor = 0.5
    output_dim = 8
    batch = 8
    non_linearity = "ReLU"

    layer_specs = build_network_spec(input_dim, factor, output_dim, non_linearity)
    max_dim = max(max(din, dout) for din, dout, _ in layer_specs)
    pad_dim = _round_up(max_dim, 128)                 # lane-dense padded width

    key = jax.random.PRNGKey(0)
    kp, kx = jax.random.split(key)
    raw_params = build_raw_params(kp, layer_specs)

    # Default production path: bf16 weights in HBM (native MXU dtype, half the
    # weight DMA).  f32 weights kept for a strict-parity check.
    w_bf16, b_f32 = stack_padded_params(raw_params, layer_specs, pad_dim, jnp.bfloat16)
    w_f32, _ = stack_padded_params(raw_params, layer_specs, pad_dim, jnp.float32)

    x = jax.random.normal(kx, (batch, input_dim), dtype=jnp.float32)

    # --- f32-weight path: exact parity with the f32 PyTorch-equivalent math ---
    out_f32 = jax.block_until_ready(
        autoencoder_forward(x, w_f32, b_f32, layer_specs=layer_specs))
    assert out_f32.shape == (batch, input_dim), out_f32.shape
    assert out_f32.dtype == jnp.float32
    ref_f32 = reference_forward(x, raw_params, layer_specs, mxu_bf16=False)
    assert jnp.allclose(out_f32, ref_f32, atol=1e-5, rtol=1e-5), \
        float(jnp.max(jnp.abs(out_f32 - ref_f32)))

    # --- bf16-weight path (default), checked against a bf16-matmul reference ---
    out_bf16 = jax.block_until_ready(
        autoencoder_forward(x, w_bf16, b_f32, layer_specs=layer_specs))
    ref_bf16 = reference_forward(x, raw_params, layer_specs, mxu_bf16=True)
    assert out_bf16.shape == (batch, input_dim)
    assert jnp.allclose(out_bf16, ref_bf16, atol=2e-2, rtol=2e-2), \
        float(jnp.max(jnp.abs(out_bf16 - ref_bf16)))

    # --- larger batch: exercise the multi-tile grid (TB=512, padded last tile) ---
    batch_big = 600
    x_big = jax.random.normal(jax.random.PRNGKey(1), (batch_big, input_dim),
                              dtype=jnp.float32)
    out_big = jax.block_until_ready(
        autoencoder_forward(x_big, w_bf16, b_f32, layer_specs=layer_specs))
    ref_big = reference_forward(x_big, raw_params, layer_specs, mxu_bf16=True)
    assert out_big.shape == (batch_big, input_dim), out_big.shape
    assert jnp.allclose(out_big, ref_big, atol=2e-2, rtol=2e-2), \
        float(jnp.max(jnp.abs(out_big - ref_big)))

    print("KERNEL_OK")
</pallas_src>

<mosaic_0001>
module attributes {stable_mosaic.version = 11 : i64} {
  func.func @_fused_ae_kernel(%arg0: i32, %arg1: memref<8x128xf32, #tpu.memory_space<vmem>>, %arg2: memref<6x128x128xf32, #tpu.memory_space<vmem>>, %arg3: memref<6x1x128xf32, #tpu.memory_space<vmem>>, %arg4: memref<8x128xf32, #tpu.memory_space<vmem>>) attributes {dimension_semantics = [#tpu.dimension_semantics<parallel>], iteration_bounds = array<i64: 1>, scalar_prefetch = 0 : i64, scratch_operands = 0 : i64, tpu.core_type = #tpu.core_type<tc>, window_params = [{transform_indices = @transform_0, window_bounds = array<i64: 8, 128>}, {pipeline_mode = #tpu.pipeline_mode<synchronous>, transform_indices = @transform_1, window_bounds = array<i64: 6, 128, 128>}, {pipeline_mode = #tpu.pipeline_mode<synchronous>, transform_indices = @transform_2, window_bounds = array<i64: 6, 1, 128>}, {transform_indices = @transform_3, window_bounds = array<i64: 8, 128>}]} {
    %c0 = arith.constant 0 : index
    %c0_0 = arith.constant 0 : index
    %0 = vector.load %arg1[%c0, %c0_0] : memref<8x128xf32, #tpu.memory_space<vmem>>, vector<8x128xf32>
    %c0_1 = arith.constant 0 : index
    %c0_2 = arith.constant 0 : index
    %c0_3 = arith.constant 0 : index
    %1 = vector.load %arg2[%c0_1, %c0_2, %c0_3] : memref<6x128x128xf32, #tpu.memory_space<vmem>>, vector<1x128x128xf32>
    %2 = vector.shape_cast %1 : vector<1x128x128xf32> to vector<128x128xf32>
    %cst = arith.constant dense<0.000000e+00> : vector<8x128xf32>
    %3 = tpu.matmul %0, %2, %cst {dimension_numbers = #tpu.dot_dimension_numbers<[1], [0], [0], [1], [0, 0, 1, 1], [], []>} : vector<8x128xf32>, vector<128x128xf32>, vector<8x128xf32> -> vector<8x128xf32>
    %c0_4 = arith.constant 0 : index
    %c0_5 = arith.constant 0 : index
    %c0_6 = arith.constant 0 : index
    %4 = vector.load %arg3[%c0_4, %c0_5, %c0_6] : memref<6x1x128xf32, #tpu.memory_space<vmem>>, vector<1x1x128xf32>
    %5 = vector.shape_cast %4 : vector<1x1x128xf32> to vector<1x128xf32>
    %6 = vector.broadcast %5 : vector<1x128xf32> to vector<8x128xf32>
    %7 = arith.addf %3, %6 : vector<8x128xf32>
    %cst_7 = arith.constant 0.000000e+00 : f32
    %8 = vector.broadcast %cst_7 : f32 to vector<8x128xf32>
    %9 = arith.maximumf %7, %8 : vector<8x128xf32>
    %c1 = arith.constant 1 : index
    %c0_8 = arith.constant 0 : index
    %c0_9 = arith.constant 0 : index
    %10 = vector.load %arg2[%c1, %c0_8, %c0_9] : memref<6x128x128xf32, #tpu.memory_space<vmem>>, vector<1x128x128xf32>
    %11 = vector.shape_cast %10 : vector<1x128x128xf32> to vector<128x128xf32>
    %cst_10 = arith.constant dense<0.000000e+00> : vector<8x128xf32>
    %12 = tpu.matmul %9, %11, %cst_10 {dimension_numbers = #tpu.dot_dimension_numbers<[1], [0], [0], [1], [0, 0, 1, 1], [], []>} : vector<8x128xf32>, vector<128x128xf32>, vector<8x128xf32> -> vector<8x128xf32>
    %c1_11 = arith.constant 1 : index
    %c0_12 = arith.constant 0 : index
    %c0_13 = arith.constant 0 : index
    %13 = vector.load %arg3[%c1_11, %c0_12, %c0_13] : memref<6x1x128xf32, #tpu.memory_space<vmem>>, vector<1x1x128xf32>
    %14 = vector.shape_cast %13 : vector<1x1x128xf32> to vector<1x128xf32>
    %15 = vector.broadcast %14 : vector<1x128xf32> to vector<8x128xf32>
    %16 = arith.addf %12, %15 : vector<8x128xf32>
    %cst_14 = arith.constant 0.000000e+00 : f32
    %17 = vector.broadcast %cst_14 : f32 to vector<8x128xf32>
    %18 = arith.maximumf %16, %17 : vector<8x128xf32>
    %c2 = arith.constant 2 : index
    %c0_15 = arith.constant 0 : index
    %c0_16 = arith.constant 0 : index
    %19 = vector.load %arg2[%c2, %c0_15, %c0_16] : memref<6x128x128xf32, #tpu.memory_space<vmem>>, vector<1x128x128xf32>
    %20 = vector.shape_cast %19 : vector<1x128x128xf32> to vector<128x128xf32>
    %cst_17 = arith.constant dense<0.000000e+00> : vector<8x128xf32>
    %21 = tpu.matmul %18, %20, %cst_17 {dimension_numbers = #tpu.dot_dimension_numbers<[1], [0], [0], [1], [0, 0, 1, 1], [], []>} : vector<8x128xf32>, vector<128x128xf32>, vector<8x128xf32> -> vector<8x128xf32>
    %c2_18 = arith.constant 2 : index
    %c0_19 = arith.constant 0 : index
    %c0_20 = arith.constant 0 : index
    %22 = vector.load %arg3[%c2_18, %c0_19, %c0_20] : memref<6x1x128xf32, #tpu.memory_space<vmem>>, vector<1x1x128xf32>
    %23 = vector.shape_cast %22 : vector<1x1x128xf32> to vector<1x128xf32>
    %24 = vector.broadcast %23 : vector<1x128xf32> to vector<8x128xf32>
    %25 = arith.addf %21, %24 : vector<8x128xf32>
    %c3 = arith.constant 3 : index
    %c0_21 = arith.constant 0 : index
    %c0_22 = arith.constant 0 : index
    %26 = vector.load %arg2[%c3, %c0_21, %c0_22] : memref<6x128x128xf32, #tpu.memory_space<vmem>>, vector<1x128x128xf32>
    %27 = vector.shape_cast %26 : vector<1x128x128xf32> to vector<128x128xf32>
    %cst_23 = arith.constant dense<0.000000e+00> : vector<8x128xf32>
    %28 = tpu.matmul %25, %27, %cst_23 {dimension_numbers = #tpu.dot_dimension_numbers<[1], [0], [0], [1], [0, 0, 1, 1], [], []>} : vector<8x128xf32>, vector<128x128xf32>, vector<8x128xf32> -> vector<8x128xf32>
    %c3_24 = arith.constant 3 : index
    %c0_25 = arith.constant 0 : index
    %c0_26 = arith.constant 0 : index
    %29 = vector.load %arg3[%c3_24, %c0_25, %c0_26] : memref<6x1x128xf32, #tpu.memory_space<vmem>>, vector<1x1x128xf32>
    %30 = vector.shape_cast %29 : vector<1x1x128xf32> to vector<1x128xf32>
    %31 = vector.broadcast %30 : vector<1x128xf32> to vector<8x128xf32>
    %32 = arith.addf %28, %31 : vector<8x128xf32>
    %cst_27 = arith.constant 0.000000e+00 : f32
    %33 = vector.broadcast %cst_27 : f32 to vector<8x128xf32>
    %34 = arith.maximumf %32, %33 : vector<8x128xf32>
    %c4 = arith.constant 4 : index
    %c0_28 = arith.constant 0 : index
    %c0_29 = arith.constant 0 : index
    %35 = vector.load %arg2[%c4, %c0_28, %c0_29] : memref<6x128x128xf32, #tpu.memory_space<vmem>>, vector<1x128x128xf32>
    %36 = vector.shape_cast %35 : vector<1x128x128xf32> to vector<128x128xf32>
    %cst_30 = arith.constant dense<0.000000e+00> : vector<8x128xf32>
    %37 = tpu.matmul %34, %36, %cst_30 {dimension_numbers = #tpu.dot_dimension_numbers<[1], [0], [0], [1], [0, 0, 1, 1], [], []>} : vector<8x128xf32>, vector<128x128xf32>, vector<8x128xf32> -> vector<8x128xf32>
    %c4_31 = arith.constant 4 : index
    %c0_32 = arith.constant 0 : index
    %c0_33 = arith.constant 0 : index
    %38 = vector.load %arg3[%c4_31, %c0_32, %c0_33] : memref<6x1x128xf32, #tpu.memory_space<vmem>>, vector<1x1x128xf32>
    %39 = vector.shape_cast %38 : vector<1x1x128xf32> to vector<1x128xf32>
    %40 = vector.broadcast %39 : vector<1x128xf32> to vector<8x128xf32>
    %41 = arith.addf %37, %40 : vector<8x128xf32>
    %cst_34 = arith.constant 0.000000e+00 : f32
    %42 = vector.broadcast %cst_34 : f32 to vector<8x128xf32>
    %43 = arith.maximumf %41, %42 : vector<8x128xf32>
    %c5 = arith.constant 5 : index
    %c0_35 = arith.constant 0 : index
    %c0_36 = arith.constant 0 : index
    %44 = vector.load %arg2[%c5, %c0_35, %c0_36] : memref<6x128x128xf32, #tpu.memory_space<vmem>>, vector<1x128x128xf32>
    %45 = vector.shape_cast %44 : vector<1x128x128xf32> to vector<128x128xf32>
    %cst_37 = arith.constant dense<0.000000e+00> : vector<8x128xf32>
    %46 = tpu.matmul %43, %45, %cst_37 {dimension_numbers = #tpu.dot_dimension_numbers<[1], [0], [0], [1], [0, 0, 1, 1], [], []>} : vector<8x128xf32>, vector<128x128xf32>, vector<8x128xf32> -> vector<8x128xf32>
    %c5_38 = arith.constant 5 : index
    %c0_39 = arith.constant 0 : index
    %c0_40 = arith.constant 0 : index
    %47 = vector.load %arg3[%c5_38, %c0_39, %c0_40] : memref<6x1x128xf32, #tpu.memory_space<vmem>>, vector<1x1x128xf32>
    %48 = vector.shape_cast %47 : vector<1x1x128xf32> to vector<1x128xf32>
    %49 = vector.broadcast %48 : vector<1x128xf32> to vector<8x128xf32>
    %50 = arith.addf %46, %49 : vector<8x128xf32>
    %c0_41 = arith.constant 0 : index
    %c0_42 = arith.constant 0 : index
    %51 = vector.load %arg4[%c0_41, %c0_42] : memref<8x128xf32, #tpu.memory_space<vmem>>, vector<8x128xf32>
    tpu.vector_store %arg4[%c0_41, %c0_42], %50 {strides = array<i32>} : memref<8x128xf32, #tpu.memory_space<vmem>>, vector<8x128xf32>,
    return
  }
  func.func @transform_0(%arg0: i32) -> (i32, i32) {
    %c0_i32 = arith.constant 0 : i32
    %c0_i32_0 = arith.constant 0 : i32
    return %arg0, %c0_i32 : i32, i32
  }
  func.func @transform_1(%arg0: i32) -> (i32, i32, i32) {
    %c0_i32 = arith.constant 0 : i32
    %c0_i32_0 = arith.constant 0 : i32
    %c0_i32_1 = arith.constant 0 : i32
    %c0_i32_2 = arith.constant 0 : i32
    return %c0_i32, %c0_i32_0, %c0_i32_1 : i32, i32, i32
  }
  func.func @transform_2(%arg0: i32) -> (i32, i32, i32) {
    %c0_i32 = arith.constant 0 : i32
    %c0_i32_0 = arith.constant 0 : i32
    %c0_i32_1 = arith.constant 0 : i32
    %c0_i32_2 = arith.constant 0 : i32
    return %c0_i32, %c0_i32_0, %c0_i32_1 : i32, i32, i32
  }
  func.func @transform_3(%arg0: i32) -> (i32, i32) {
    %c0_i32 = arith.constant 0 : i32
    %c0_i32_0 = arith.constant 0 : i32
    return %arg0, %c0_i32 : i32, i32
  }
}

</mosaic_0001>

<bundles_post_ra>
// kernel: autoencoder_forward.1
= control target key start
LH: loop header
LB: loop body
LE: loop exit
PB: predicated region body
PF: predicated region fallthrough
CT: control target
= control target key end

     0   :  { %8 = vsyncpa [#allocation3], 0  ;;  %s1272_s0 = inlined_call_operand.vmem [shape: f32[8,128], index: 0, kind: input, shape index: {}]   ;;  %s1273_s1 = inlined_call_operand.hbm [shape: f32[6,128,128], index: 1, kind: input, shape index: {}]   ;;  %s1274_s2 = inlined_call_operand.vmem [shape: f32[6,1,128], index: 2, kind: input, shape index: {}]   ;;  %s1275_s3 = inlined_call_operand.hbm [shape: f32[8,128], index: 3, kind: output, shape index: {}]  }
   0x1   :  { %9 = vsyncpa [#allocation4], 0  ;;  %s1140_s12 = smov [#allocation2]   ;;  %s1092_s16 = scalar_lea.hbm %s1273_s1, 12288 }
   0x2   :  { %s17_s13 = sshll.u32 %s1140_s12, 4  ;;  %p1093_p0 = scmp.ne.s32.totalorder %s1273_s1, %s1092_s16  ;;  %s18_s13 = int_to_ptr.vmem [resolvable:$true] %s17_s13 }
   0x3   :  { %p1096_p1 = scmp.lt.u32.totalorder %s1092_s16, %s1273_s1 }
   0x5   :  { %p1098_p2 = pnand %p1096_p1, %p1093_p0 }
   0x7   :  { %1101 = shalt.err (!%p1098_p2)
}
   0x8   :  { %s1102_s21 = scalar_lea.vmem %s18_s13, 12288  ;;  %p1107_p4 = scmp.lt.s32.totalorder %s18_s13, %s18_s13 }
   0x9   :  { %p1103_p3 = scmp.ne.s32.totalorder %s18_s13, %s1102_s21  ;;  %p1108_p5 = scmp.lt.s32.totalorder %s1102_s21, %s1102_s21 }
   0xb   :  { %p1109_p6 = por %p1108_p5, %p1107_p4 }
   0xd   :  { %p1110_p7 = pnand %p1109_p6, %p1103_p3 }
   0xf   :  { %1113 = shalt.err (!%p1110_p7)
}
  0x10   :  { %s1141_s22 = smov 128   ;;  %s1142_s23 = smov 8  }
  0x11   :  { %23 = dma.hbm_to_vmem [thread:$0]  %s1273_s1, 12288, %s18_s13, [#allocation3], %s1141_s22, %s1141_s22, %s1142_s23  }
  0x12   :  { %1136 = dma.done.wait [#allocation3], 12288  }
  0x13   :  { %1137 = vsyncadd [#allocation3], 4294955008  ;;  %v1143_v0 = vmov 0.0|0.0   ;;  %vm1144_vm0 = vmmov 0   ;;  %v1145_v1 = vmov 0.0   ;;  %v30_v2 = vld [vmem:[#allocation2] sm:$0xff] }
  0x14   :  { %941 = vmatprep.subr.bf16.mxu0 %v1143_v0  ;;  %763 = vmatprep.mubr.msk.f32.mxu0 %vm1144_vm0, %v1145_v1  ;;  %v31_v3 = vld [vmem:[#allocation2 + $0x8] sm:$0xff]  ;;  %v32_v4 = vld [vmem:[#allocation2 + $0x10] sm:$0xff]  ;;  %v33_v6 = vld [vmem:[#allocation2 + $0x18] sm:$0xff]  ;;  %s1146_s11 = smov [#allocation5]  }
  0x15   :  { %965 = vmatprep.subr.bf16.mxu1 %v1143_v0  ;;  %798 = vmatprep.mubr.msk.f32.mxu1 %vm1144_vm0, %v1145_v1  ;;  %v942_v5 = vpack.c.bf16 %v31_v3, %v30_v2  ;;  %v945_v7 = vpack.c.bf16 %v33_v6, %v32_v4  ;;  %v34_v8 = vld [vmem:[#allocation2 + $0x20] sm:$0xff]  ;;  %v35_v9 = vld [vmem:[#allocation2 + $0x28] sm:$0xff]  ;;  %v127_v12 = vld [vmem:[#allocation2 + $0x90] sm:$0xff]  ;;  %s609_s12 = sshll.u32 %s1146_s11, 4  ;;  %s610_s12 = int_to_ptr.vmem [resolvable:$true] %s609_s12 }
  0x16   :  { %v125_v10 = vld [vmem:[#allocation2 + $0x80] sm:$0xff]  ;;  %v126_v11 = vld [vmem:[#allocation2 + $0x88] sm:$0xff]  ;;  %v128_v13 = vld [vmem:[#allocation2 + $0x98] sm:$0xff]  ;;  %v948_v14 = vpack.c.bf16 %v35_v9, %v34_v8  ;;  %s1114_s13 = scalar_lea.vmem %s610_s12, 128  ;;  %p1119_p9 = scmp.lt.s32.totalorder %s610_s12, %s610_s12 }
  0x17   :  { %943 = vmatpush3.bf16.msra.mxu0 %v942_v5  ;;  %v966_v15 = vpack.c.bf16 %v126_v11, %v125_v10  ;;  %v36_v16 = vld [vmem:[#allocation2 + $0x30] sm:$0xff]  ;;  %v37_v17 = vld [vmem:[#allocation2 + $0x38] sm:$0xff]  ;;  %v969_v18 = vpack.c.bf16 %v128_v13, %v127_v12  ;;  %v129_v19 = vld [vmem:[#allocation2 + $0xa0] sm:$0xff]  ;;  %p1115_p8 = scmp.ne.s32.totalorder %s610_s12, %s1114_s13  ;;  %p1120_p10 = scmp.lt.s32.totalorder %s1114_s13, %s1114_s13 }
  0x18   :  { %944 = vmatprep.subr.bf16.mxu0 %v1143_v0  ;;  %v130_v20 = vld [vmem:[#allocation2 + $0xa8] sm:$0xff]  ;;  %v951_v21 = vpack.c.bf16 %v37_v17, %v36_v16  ;;  %v38_v22 = vld [vmem:[#allocation2 + $0x40] sm:$0xff]  ;;  %v131_v25 = vld [vmem:[#allocation2 + $0xb0] sm:$0xff] }
  0x19   :  { %967 = vmatpush3.bf16.msra.mxu1 %v966_v15  ;;  %v39_v23 = vld [vmem:[#allocation2 + $0x48] sm:$0xff]  ;;  %v972_v24 = vpack.c.bf16 %v130_v20, %v129_v19  ;;  %v132_v26 = vld [vmem:[#allocation2 + $0xb8] sm:$0xff]  ;;  %v40_v28 = vld [vmem:[#allocation2 + $0x50] sm:$0xff]  ;;  %p1121_p11 = por %p1120_p10, %p1119_p9 }
  0x1a   :  { %968 = vmatprep.subr.bf16.mxu1 %v1143_v0  ;;  %v954_v27 = vpack.c.bf16 %v39_v23, %v38_v22  ;;  %v41_v29 = vld [vmem:[#allocation2 + $0x58] sm:$0xff]  ;;  %v975_v30 = vpack.c.bf16 %v132_v26, %v131_v25  ;;  %v133_v31 = vld [vmem:[#allocation2 + $0xc0] sm:$0xff]  ;;  %v134_v32 = vld [vmem:[#allocation2 + $0xc8] sm:$0xff] }
  0x1b   :  { %946 = vmatpush3.bf16.msra.mxu0 %v945_v7  ;;  %v957_v33 = vpack.c.bf16 %v41_v29, %v40_v28  ;;  %v42_v34 = vld [vmem:[#allocation2 + $0x60] sm:$0xff]  ;;  %v43_v35 = vld [vmem:[#allocation2 + $0x68] sm:$0xff]  ;;  %v978_v36 = vpack.c.bf16 %v134_v32, %v133_v31  ;;  %v135_v37 = vld [vmem:[#allocation2 + $0xd0] sm:$0xff]  ;;  %p1122_p12 = pnand %p1121_p11, %p1115_p8 }
  0x1c   :  { %947 = vmatprep.subr.bf16.mxu0 %v1143_v0  ;;  %v136_v38 = vld [vmem:[#allocation2 + $0xd8] sm:$0xff]  ;;  %v960_v39 = vpack.c.bf16 %v43_v35, %v42_v34  ;;  %v44_v40 = vld [vmem:[#allocation2 + $0x70] sm:$0xff]  ;;  %v137_v43 = vld [vmem:[#allocation2 + $0xe0] sm:$0xff] }
  0x1d   :  { %970 = vmatpush3.bf16.msra.mxu1 %v969_v18  ;;  %v45_v41 = vld [vmem:[#allocation2 + $0x78] sm:$0xff]  ;;  %v981_v42 = vpack.c.bf16 %v136_v38, %v135_v37  ;;  %v138_v44 = vld [vmem:[#allocation2 + $0xe8] sm:$0xff]  ;;  %v29_v47 = vld [vmem:[%s1272_s0] sm:$0xff] }
  0x1e   :  { %971 = vmatprep.subr.bf16.mxu1 %v1143_v0  ;;  %v963_v45 = vpack.c.bf16 %v45_v41, %v44_v40  ;;  %v984_v46 = vpack.c.bf16 %v138_v44, %v137_v43  ;;  %v139_v48 = vld [vmem:[#allocation2 + $0xf0] sm:$0xff]  ;;  %v140_v49 = vld [vmem:[#allocation2 + $0xf8] sm:$0xff]  ;;  %v221_v51 = vld [vmem:[#allocation2 + $0x100] sm:$0xff] }
  0x1f   :  { %949 = vmatpush3.bf16.msra.mxu0 %v948_v14  ;;  %v987_v50 = vpack.c.bf16 %v140_v49, %v139_v48  ;;  %v222_v52 = vld [vmem:[#allocation2 + $0x108] sm:$0xff]  ;;  %v223_v53 = vld [vmem:[#allocation2 + $0x110] sm:$0xff]  ;;  %v224_v55 = vld [vmem:[#allocation2 + $0x118] sm:$0xff] }
  0x20   :  { %950 = vmatprep.subr.bf16.mxu0 %v1143_v0  ;;  %v990_v54 = vpack.c.bf16 %v222_v52, %v221_v51  ;;  %v993_v56 = vpack.c.bf16 %v224_v55, %v223_v53  ;;  %v225_v57 = vld [vmem:[#allocation2 + $0x120] sm:$0xff]  ;;  %v226_v58 = vld [vmem:[#allocation2 + $0x128] sm:$0xff]  ;;  %v227_v60 = vld [vmem:[#allocation2 + $0x130] sm:$0xff] }
  0x21   :  { %973 = vmatpush3.bf16.msra.mxu1 %v972_v24  ;;  %v996_v59 = vpack.c.bf16 %v226_v58, %v225_v57  ;;  %v228_v61 = vld [vmem:[#allocation2 + $0x138] sm:$0xff]  ;;  %v229_v63 = vld [vmem:[#allocation2 + $0x140] sm:$0xff]  ;;  %v230_v2 = vld [vmem:[#allocation2 + $0x148] sm:$0xff] }
  0x22   :  { %974 = vmatprep.subr.bf16.mxu1 %v1143_v0  ;;  %v999_v62 = vpack.c.bf16 %v228_v61, %v227_v60  ;;  %v1002_v3 = vpack.c.bf16 %v230_v2, %v229_v63  ;;  %v231_v4 = vld [vmem:[#allocation2 + $0x150] sm:$0xff]  ;;  %v232_v5 = vld [vmem:[#allocation2 + $0x158] sm:$0xff]  ;;  %v233_v7 = vld [vmem:[#allocation2 + $0x160] sm:$0xff] }
  0x23   :  { %952 = vmatpush3.bf16.msra.mxu0 %v951_v21  ;;  %v1005_v6 = vpack.c.bf16 %v232_v5, %v231_v4  ;;  %v234_v8 = vld [vmem:[#allocation2 + $0x168] sm:$0xff]  ;;  %v618_v10 = vld [vmem:[%s1274_s2] ss:$0 sm:$0xff]  ;;  %v235_v15 = vld [vmem:[#allocation2 + $0x170] sm:$0xff] }
  0x24   :  { %953 = vmatprep.subr.bf16.mxu0 %v1143_v0  ;;  %v1008_v9 = vpack.c.bf16 %v234_v8, %v233_v7  ;;  %v236_v16 = vld [vmem:[#allocation2 + $0x178] sm:$0xff]  ;;  %v316_v18 = vld [vmem:[#allocation2 + $0x180] sm:$0xff]  ;;  %v317_v19 = vld [vmem:[#allocation2 + $0x188] sm:$0xff] }
  0x25   :  { %976 = vmatpush3.bf16.msra.mxu1 %v975_v30  ;;  %v1011_v17 = vpack.c.bf16 %v236_v16, %v235_v15  ;;  %v318_v20 = vld [vmem:[#allocation2 + $0x190] sm:$0xff]  ;;  %v1014_v21 = vpack.c.bf16 %v317_v19, %v316_v18  ;;  %v319_v22 = vld [vmem:[#allocation2 + $0x198] sm:$0xff]  ;;  %v320_v24 = vld [vmem:[#allocation2 + $0x1a0] sm:$0xff] }
  0x26   :  { %977 = vmatprep.subr.bf16.mxu1 %v1143_v0  ;;  %v1017_v23 = vpack.c.bf16 %v319_v22, %v318_v20  ;;  %v321_v25 = vld [vmem:[#allocation2 + $0x1a8] sm:$0xff]  ;;  %v323_v28 = vld [vmem:[#allocation2 + $0x1b8] sm:$0xff]  ;;  %v324_v30 = vld [vmem:[#allocation2 + $0x1c0] sm:$0xff] }
  0x27   :  { %955 = vmatpush3.bf16.msra.mxu0 %v954_v27  ;;  %v1020_v26 = vpack.c.bf16 %v321_v25, %v320_v24  ;;  %v322_v27 = vld [vmem:[#allocation2 + $0x1b0] sm:$0xff]  ;;  %v325_v31 = vld [vmem:[#allocation2 + $0x1c8] sm:$0xff]  ;;  %v327_v34 = vld [vmem:[#allocation2 + $0x1d8] sm:$0xff] }
  0x28   :  { %956 = vmatprep.subr.bf16.mxu0 %v1143_v0  ;;  %v1023_v29 = vpack.c.bf16 %v323_v28, %v322_v27  ;;  %v1026_v32 = vpack.c.bf16 %v325_v31, %v324_v30  ;;  %v329_v37 = vld [vmem:[#allocation2 + $0x1e8] sm:$0xff]  ;;  %v330_v44 = vld [vmem:[#allocation2 + $0x1f0] sm:$0xff]  ;;  %v415_v51 = vld [vmem:[#allocation2 + $0x218] sm:$0xff] }
  0x29   :  { %979 = vmatpush3.bf16.msra.mxu1 %v978_v36  ;;  %v328_v36 = vld [vmem:[#allocation2 + $0x1e0] sm:$0xff]  ;;  %v413_v48 = vld [vmem:[#allocation2 + $0x208] sm:$0xff]  ;;  %v414_v49 = vld [vmem:[#allocation2 + $0x210] sm:$0xff] }
  0x2a   :  { %980 = vmatprep.subr.bf16.mxu1 %v1143_v0  ;;  %v1032_v38 = vpack.c.bf16 %v329_v37, %v328_v36  ;;  %v1041_v52 = vpack.c.bf16 %v415_v51, %v414_v49  ;;  %v416_v53 = vld [vmem:[#allocation2 + $0x220] sm:$0xff]  ;;  %v419_v57 = vld [vmem:[#allocation2 + $0x238] sm:$0xff]  ;;  %v421_v60 = vld [vmem:[#allocation2 + $0x248] sm:$0xff] }
  0x2b   :  { %958 = vmatpush3.bf16.msra.mxu0 %v957_v33  ;;  %v326_v33 = vld [vmem:[#allocation2 + $0x1d0] sm:$0xff]  ;;  %v423_v63 = vld [vmem:[#allocation2 + $0x258] sm:$0xff]  ;;  %v425_v4 = vld [vmem:[#allocation2 + $0x268] sm:$0xff] }
  0x2c   :  { %959 = vmatprep.subr.bf16.mxu0 %v1143_v0  ;;  %v1029_v35 = vpack.c.bf16 %v327_v34, %v326_v33  ;;  %v510_v15 = vld [vmem:[#allocation2 + $0x290] sm:$0xff]  ;;  %v512_v19 = vld [vmem:[#allocation2 + $0x2a0] sm:$0xff]  ;;  %v513_v20 = vld [vmem:[#allocation2 + $0x2a8] sm:$0xff] }
  0x2d   :  { %982 = vmatpush3.bf16.msra.mxu1 %v981_v42  ;;  %v515_v22 = vld [vmem:[#allocation2 + $0x2b8] sm:$0xff]  ;;  %v516_v24 = vld [vmem:[#allocation2 + $0x2c0] sm:$0xff]  ;;  %v517_v25 = vld [vmem:[#allocation2 + $0x2c8] sm:$0xff] }
  0x2e   :  { %983 = vmatprep.subr.bf16.mxu1 %v1143_v0  ;;  %v518_v27 = vld [vmem:[#allocation2 + $0x2d0] sm:$0xff]  ;;  %v519_v28 = vld [vmem:[#allocation2 + $0x2d8] sm:$0xff]  ;;  %v520_v30 = vld [vmem:[#allocation2 + $0x2e0] sm:$0xff] }
  0x2f   :  { %961 = vmatpush3.bf16.msra.mxu0 %v960_v39  ;;  %v620_v39 = vld [vmem:[%s1274_s2 + $0x1] ss:$0 sm:$0xff]  ;;  %v521_v31 = vld [vmem:[#allocation2 + $0x2e8] sm:$0xff]  ;;  %v624_v33 = vld [vmem:[%s1274_s2 + $0x3] ss:$0 sm:$0xff] }
  0x30   :  { %962 = vmatprep.subr.bf16.mxu0 %v1143_v0 }
  0x31   :  { %985 = vmatpush3.bf16.msra.mxu1 %v984_v46 }
  0x32   :  { %986 = vmatprep.subr.bf16.mxu1 %v1143_v0 }
  0x33   :  { %964 = vmatpush3.bf16.msra.mxu0 %v963_v45  ;;  %v331_v45 = vld [vmem:[#allocation2 + $0x1f8] sm:$0xff] }
  0x34   :  { %989 = vmatprep.subr.bf16.mxu0 %v1143_v0  ;;  %v1035_v46 = vpack.c.bf16 %v331_v45, %v330_v44  ;;  %v628_v45 = vld [vmem:[%s1274_s2 + $0x5] ss:$0 sm:$0xff] }
  0x35   :  { %988 = vmatpush3.bf16.msra.mxu1 %v987_v50 }
  0x36   :  { %764 = vmatmul.mubr.f32.vlgmr.msra.gmra.mrb[0].mxu0 %v29_v47  ;;  %1013 = vmatprep.subr.bf16.mxu1 %v1143_v0  ;;  %v412_v47 = vld [vmem:[#allocation2 + $0x200] sm:$0xff] }
  0x37   :  { %833 = vmatprep.mubr.msk.f32.mxu0 %vm1144_vm0, %v1145_v1  ;;  %991 = vmatpush3.bf16.msra.mxu0 %v990_v54  ;;  %v1038_v50 = vpack.c.bf16 %v413_v48, %v412_v47  ;;  %v417_v54 = vld [vmem:[#allocation2 + $0x228] sm:$0xff] }
  0x38   :  { %992 = vmatprep.subr.bf16.mxu0 %v1143_v0  ;;  %v1044_v55 = vpack.c.bf16 %v417_v54, %v416_v53 }
  0x3b   :  { %994 = vmatpush3.bf16.msra.mxu0 %v993_v56  ;;  %v418_v56 = vld [vmem:[#allocation2 + $0x230] sm:$0xff] }
  0x3c   :  { %995 = vmatprep.subr.bf16.mxu0 %v1143_v0  ;;  %v1047_v58 = vpack.c.bf16 %v419_v57, %v418_v56 }
  0x3f   :  { %997 = vmatpush3.bf16.msra.mxu0 %v996_v59  ;;  %v420_v59 = vld [vmem:[#allocation2 + $0x240] sm:$0xff] }
  0x40   :  { %998 = vmatprep.subr.bf16.mxu0 %v1143_v0  ;;  %v1050_v61 = vpack.c.bf16 %v421_v60, %v420_v59 }
  0x43   :  { %1000 = vmatpush3.bf16.msra.mxu0 %v999_v62  ;;  %v422_v62 = vld [vmem:[#allocation2 + $0x250] sm:$0xff] }
  0x44   :  { %1001 = vmatprep.subr.bf16.mxu0 %v1143_v0  ;;  %v1053_v2 = vpack.c.bf16 %v423_v63, %v422_v62 }
  0x47   :  { %1003 = vmatpush3.bf16.msra.mxu0 %v1002_v3  ;;  %v424_v3 = vld [vmem:[#allocation2 + $0x260] sm:$0xff] }
  0x48   :  { %1004 = vmatprep.subr.bf16.mxu0 %v1143_v0  ;;  %v1056_v5 = vpack.c.bf16 %v425_v4, %v424_v3 }
  0x4b   :  { %1006 = vmatpush3.bf16.msra.mxu0 %v1005_v6  ;;  %v622_v6 = vld [vmem:[%s1274_s2 + $0x2] ss:$0 sm:$0xff] }
  0x4c   :  { %1007 = vmatprep.subr.bf16.mxu0 %v1143_v0 }
  0x4f   :  { %1009 = vmatpush3.bf16.msra.mxu0 %v1008_v9 }
  0x50   :  { %1010 = vmatprep.subr.bf16.mxu0 %v1143_v0 }
  0x53   :  { %1012 = vmatpush3.bf16.msra.mxu0 %v1011_v17  ;;  %v511_v17 = vld [vmem:[#allocation2 + $0x298] sm:$0xff] }
  0x54   :  { %1037 = vmatprep.subr.bf16.mxu0 %v1143_v0  ;;  %v1065_v18 = vpack.c.bf16 %v511_v17, %v510_v15 }
 0x109   :  { %v119_v11 = vpop.f32.mrb[0].mxu0 }
 0x10a   :  { %v120_v12 = vadd.f32 %v618_v10, %v119_v11  ;;  %v765_v13 = vpop.f32.mrb[1].mxu0  ;;  %v426_v10 = vld [vmem:[#allocation2 + $0x270] sm:$0xff]  ;;  %v427_v11 = vld [vmem:[#allocation2 + $0x278] sm:$0xff] }
 0x10b   :  { %v508_v13 = vld [vmem:[#allocation2 + $0x280] sm:$0xff] }
 0x10c   :  { %v123_v14 = vmax.f32 %v120_v12, 0.0  ;;  %v1059_v12 = vpack.c.bf16 %v427_v11, %v426_v10 }
 0x10e   :  { %799 = vmatmul.mubr.f32.vlgmr.msra.gmra.mrb[0].mxu1 %v123_v14  ;;  %v509_v14 = vld [vmem:[#allocation2 + $0x288] sm:$0xff] }
 0x10f   :  { %868 = vmatprep.mubr.msk.f32.mxu1 %vm1144_vm0, %v1145_v1  ;;  %1015 = vmatpush3.bf16.msra.mxu1 %v1014_v21  ;;  %v1062_v16 = vpack.c.bf16 %v509_v14, %v508_v13  ;;  %v1068_v21 = vpack.c.bf16 %v513_v20, %v512_v19 }
 0x110   :  { %1016 = vmatprep.subr.bf16.mxu1 %v1143_v0 }
 0x113   :  { %1018 = vmatpush3.bf16.msra.mxu1 %v1017_v23 }
 0x114   :  { %1019 = vmatprep.subr.bf16.mxu1 %v1143_v0 }
 0x117   :  { %1021 = vmatpush3.bf16.msra.mxu1 %v1020_v26  ;;  %v1074_v26 = vpack.c.bf16 %v517_v25, %v516_v24 }
 0x118   :  { %1022 = vmatprep.subr.bf16.mxu1 %v1143_v0 }
 0x11b   :  { %1024 = vmatpush3.bf16.msra.mxu1 %v1023_v29  ;;  %v1077_v29 = vpack.c.bf16 %v519_v28, %v518_v27 }
 0x11c   :  { %1025 = vmatprep.subr.bf16.mxu1 %v1143_v0 }
 0x11f   :  { %1027 = vmatpush3.bf16.msra.mxu1 %v1026_v32  ;;  %v1080_v32 = vpack.c.bf16 %v521_v31, %v520_v30 }
 0x120   :  { %1028 = vmatprep.subr.bf16.mxu1 %v1143_v0 }
 0x123   :  { %1030 = vmatpush3.bf16.msra.mxu1 %v1029_v35 }
 0x124   :  { %1031 = vmatprep.subr.bf16.mxu1 %v1143_v0 }
 0x127   :  { %1033 = vmatpush3.bf16.msra.mxu1 %v1032_v38  ;;  %v522_v38 = vld [vmem:[#allocation2 + $0x2f0] sm:$0xff] }
 0x128   :  { %1034 = vmatprep.subr.bf16.mxu1 %v1143_v0 }
 0x12b   :  { %1036 = vmatpush3.bf16.msra.mxu1 %v1035_v46 }
 0x12c   :  { %1061 = vmatprep.subr.bf16.mxu1 %v1143_v0 }
 0x1e1   :  { %v215_v40 = vpop.f32.mrb[0].mxu1 }
 0x1e2   :  { %v216_v41 = vadd.f32 %v620_v39, %v215_v40  ;;  %v800_v42 = vpop.f32.mrb[1].mxu1  ;;  %v523_v39 = vld [vmem:[#allocation2 + $0x2f8] sm:$0xff] }
 0x1e3   :  { %v1083_v40 = vpack.c.bf16 %v523_v39, %v522_v38 }
 0x1e4   :  { %v219_v43 = vmax.f32 %v216_v41, 0.0  ;;  %v626_v41 = vld [vmem:[%s1274_s2 + $0x4] ss:$0 sm:$0xff] }
 0x1e6   :  { %834 = vmatmul.mubr.f32.vlgmr.msra.gmra.mrb[2].mxu0 %v219_v43 }
 0x1e7   :  { %903 = vmatprep.mubr.msk.f32.mxu0 %vm1144_vm0, %v1145_v1  ;;  %1039 = vmatpush3.bf16.msra.mxu0 %v1038_v50 }
 0x1e8   :  { %1040 = vmatprep.subr.bf16.mxu0 %v1143_v0 }
 0x1eb   :  { %1042 = vmatpush3.bf16.msra.mxu0 %v1041_v52 }
 0x1ec   :  { %1043 = vmatprep.subr.bf16.mxu0 %v1143_v0 }
 0x1ef   :  { %1045 = vmatpush3.bf16.msra.mxu0 %v1044_v55 }
 0x1f0   :  { %1046 = vmatprep.subr.bf16.mxu0 %v1143_v0 }
 0x1f3   :  { %1048 = vmatpush3.bf16.msra.mxu0 %v1047_v58 }
 0x1f4   :  { %1049 = vmatprep.subr.bf16.mxu0 %v1143_v0 }
 0x1f7   :  { %1051 = vmatpush3.bf16.msra.mxu0 %v1050_v61 }
 0x1f8   :  { %1052 = vmatprep.subr.bf16.mxu0 %v1143_v0 }
 0x1fb   :  { %1054 = vmatpush3.bf16.msra.mxu0 %v1053_v2 }
 0x1fc   :  { %1055 = vmatprep.subr.bf16.mxu0 %v1143_v0 }
 0x1ff   :  { %1057 = vmatpush3.bf16.msra.mxu0 %v1056_v5 }
 0x200   :  { %1058 = vmatprep.subr.bf16.mxu0 %v1143_v0 }
 0x203   :  { %1060 = vmatpush3.bf16.msra.mxu0 %v1059_v12 }
 0x2b9   :  { %v311_v7 = vpop.f32.mrb[2].mxu0 }
 0x2ba   :  { %v312_v8 = vadd.f32 %v622_v6, %v311_v7  ;;  %v835_v9 = vpop.f32.mrb[3].mxu0 }
 0x2bc   :  { %869 = vmatmul.mubr.f32.vlgmr.msra.gmra.mrb[2].mxu1 %v312_v8 }
 0x2bd   :  { %938 = vmatprep.mubr.msk.f32.mxu1 %vm1144_vm0, %v1145_v1  ;;  %1063 = vmatpush3.bf16.msra.mxu1 %v1062_v16  ;;  %v514_v1 = vld [vmem:[#allocation2 + $0x2b0] sm:$0xff] }
 0x2be   :  { %1064 = vmatprep.subr.bf16.mxu1 %v1143_v0  ;;  %v1071_v23 = vpack.c.bf16 %v515_v22, %v514_v1 }
 0x2c1   :  { %1066 = vmatpush3.bf16.msra.mxu1 %v1065_v18 }
 0x2c2   :  { %1067 = vmatprep.subr.bf16.mxu1 %v1143_v0 }
 0x2c5   :  { %1069 = vmatpush3.bf16.msra.mxu1 %v1068_v21 }
 0x2c6   :  { %1070 = vmatprep.subr.bf16.mxu1 %v1143_v0 }
 0x2c9   :  { %1072 = vmatpush3.bf16.msra.mxu1 %v1071_v23 }
 0x2ca   :  { %1073 = vmatprep.subr.bf16.mxu1 %v1143_v0 }
 0x2cd   :  { %1075 = vmatpush3.bf16.msra.mxu1 %v1074_v26 }
 0x2ce   :  { %1076 = vmatprep.subr.bf16.mxu1 %v1143_v0 }
 0x2d1   :  { %1078 = vmatpush3.bf16.msra.mxu1 %v1077_v29 }
 0x2d2   :  { %1079 = vmatprep.subr.bf16.mxu1 %v1143_v0 }
 0x2d5   :  { %1081 = vmatpush3.bf16.msra.mxu1 %v1080_v32 }
 0x2d6   :  { %1082 = vmatprep.subr.bf16.mxu1 %v1143_v0 }
 0x2d9   :  { %1084 = vmatpush3.bf16.msra.mxu1 %v1083_v40 }
 0x38f   :  { %v406_v34 = vpop.f32.mrb[2].mxu1 }
 0x390   :  { %v407_v35 = vadd.f32 %v624_v33, %v406_v34  ;;  %v870_v36 = vpop.f32.mrb[3].mxu1 }
 0x392   :  { %v410_v37 = vmax.f32 %v407_v35, 0.0 }
 0x394   :  { %904 = vmatmul.mubr.f32.vlgmr.msra.gmra.mrb[4].mxu0 %v410_v37 }
 0x467   :  { %v502_v42 = vpop.f32.mrb[4].mxu0 }
 0x468   :  { %v503_v43 = vadd.f32 %v626_v41, %v502_v42  ;;  %v905_v0 = vpop.f32.mrb[5].mxu0 }
 0x46a   :  { %v506_v44 = vmax.f32 %v503_v43, 0.0 }
 0x46c   :  { %939 = vmatmul.mubr.f32.vlgmr.msra.gmra.mrb[4].mxu1 %v506_v44 }
 0x53f   :  { %v598_v46 = vpop.f32.mrb[4].mxu1 }
 0x540   :  { %v599_v47 = vadd.f32 %v628_v45, %v598_v46  ;;  %v940_v48 = vpop.f32.mrb[5].mxu1 }
 0x542   :  { %602 = vst [vmem:[#allocation5] sm:$0xff] %v599_v47 }
 0x543   :  { %1125 = shalt.err (!%p1122_p12)
}
 0x544   :  { %s1126_s16 = scalar_lea.hbm %s1275_s3, 128 }
 0x545   :  { %p1127_p13 = scmp.ne.s32.totalorder %s1275_s3, %s1126_s16  ;;  %p1130_p0 = scmp.lt.u32.totalorder %s1126_s16, %s1275_s3 }
 0x547   :  { %p1132_p1 = pnand %p1130_p0, %p1127_p13 }
 0x549   :  { %1135 = shalt.err (!%p1132_p1)
}
 0x54a   :  { %612 = dma.vmem_to_hbm [thread:$0]  %s610_s12, 128, %s1275_s3, [#allocation4]  }
 0x54b   :  { %1138 = dma.done.wait [#allocation4], 128  }
 0x54c   :  { %1139 = vsyncadd [#allocation4], 4294967168 }
 0x54d   :  { %616 = vsyncpa [#allocation3], 1 }
 0x54e   :  { %617 = vsyncpa [#allocation4], 1 }

</bundles_post_ra>
